<compile_context>
chip_gen: v7x
topology: tpu7x:2x2x1
jax: 0.10.0
libtpu: 0.0.40
codegen_flags: <defaults>
</compile_context>

<pallas_src>
import jax
import jax.numpy as jnp
from jax import lax
from jax.experimental import pallas as pl
from jax.experimental.pallas import tpu as pltpu


def _prediction_kernel(x_ref, wt_ref, bt_ref, out_ref):
    # logits^T [C, tb] = wT [C, F] . x [tb, F]^T   (contract F on both sides;
    # the transposed-rhs form is MXU-native -- same pattern as q @ k^T in
    # attention -- so the large x tile never goes through an XLU transpose).
    logits_t = lax.dot_general(
        wt_ref[...], x_ref[...],
        dimension_numbers=(((1,), (1,)), ((), ())),
        preferred_element_type=jnp.float32,
    ) + bt_ref[...]                                    # [C, tb] + [C, 1]

    # dropout: identity (eval mode).
    # Numerically stable softmax over the class axis (C=3 sublanes).  All of
    # this is lane-dense: ~tb/128 vregs instead of tb/8 mostly-empty ones.
    m = jnp.max(logits_t, axis=0, keepdims=True)       # [1, tb] sublane reduce
    e = jnp.exp(logits_t - m)                          # [C, tb]
    denom = jnp.sum(e, axis=0, keepdims=True)          # [1, tb] sublane reduce
    out_ref[...] = (e / denom).astype(out_ref.dtype)   # lane-dense store


def fold_prediction_params(w1, b1, w2, b2):
    """Fold the two affine layers (no nonlinearity between them).

    Returns (wT [C, F], bT [C, 1]) in the lane-major layout the kernel uses.
    Fold once and reuse for repeated inference (or run prediction_layer under
    jax.jit so XLA constant-folds it) -- it should not sit on the hot path.
    """
    w = jnp.dot(w1, w2)               # [F, C]
    b = jnp.dot(b1, w2) + b2          # [1, C]
    return w.T, b.T                   # [C, F], [C, 1]


def prediction_layer_folded(x, wT, bT, *, block_rows=2048, dot_dtype=None,
                            x_buffer_count=2):
    """x: [B, F] f32; wT: [C, F] folded weight; bT: [C, 1] folded bias.

    Returns softmax probabilities [B, C] in f32.

    dot_dtype: jnp.bfloat16 halves the HBM bytes read for x/wT (the kernel is
               x-read bound); expect ~1e-3 error vs. the f32 reference.
    x_buffer_count: pipeline depth for the x-tile DMA (2 = default double
               buffering; 3 is a cheap sweep if DMA is ever exposed).
    """
    B, F = x.shape
    C, Fw = wT.shape
    assert Fw == F and bT.shape == (C, 1)

    if dot_dtype is not None:
        x = x.astype(dot_dtype)
        wT = wT.astype(dot_dtype)

    # Row tile: big enough to hide the ~0.35 us per-grid-step overhead, small
    # enough that double-buffered tiles fit default scoped VMEM everywhere.
    block_rows = max(128, ((int(block_rows) + 127) // 128) * 128)
    if B <= block_rows:
        tb = B          # single step; full-extent blocks are always legal
    else:
        # Multiple of 128 (lane-dense output blocks, (8,128) rule satisfied)
        # and >= 2 grid steps so v7x's two TensorCores can split the batch.
        tb = min(block_rows, ((pl.cdiv(B, 2) + 127) // 128) * 128)
    grid = (pl.cdiv(B, tb),)

    x_spec_kwargs = {}
    if x_buffer_count != 2:
        x_spec_kwargs["pipeline_mode"] = pl.Buffered(x_buffer_count)
    x_spec = pl.BlockSpec((tb, F), lambda i: (i, 0), **x_spec_kwargs)

    out_t = pl.pallas_call(
        _prediction_kernel,
        out_shape=jax.ShapeDtypeStruct((C, B), jnp.float32),
        grid_spec=pltpu.PrefetchScalarGridSpec(
            num_scalar_prefetch=0,
            grid=grid,
            in_specs=[
                x_spec,                                   # x: row tiles
                pl.BlockSpec((C, F), lambda i: (0, 0)),   # folded W^T: resident
                pl.BlockSpec((C, 1), lambda i: (0, 0)),   # folded b^T: resident
            ],
            out_specs=pl.BlockSpec((C, tb), lambda i: (0, i)),
        ),
        compiler_params=pltpu.CompilerParams(
            dimension_semantics=("parallel",)),
    )(x, wT, bT)

    # Tiny [C, B] -> [B, C] transpose in the wrapper (C*B*4 bytes; negligible
    # next to the x read the kernel performs).
    return out_t.T


def prediction_layer(x, w1, b1, w2, b2, **kwargs):
    """Convenience wrapper: folds the parameters, then runs the kernel."""
    wT, bT = fold_prediction_params(w1, b1, w2, b2)
    return prediction_layer_folded(x, wT, bT, **kwargs)


def _reference(x, w1, b1, w2, b2):
    h = x @ w1 + b1
    logits = h @ w2 + b2
    return jax.nn.softmax(logits, axis=-1)


if __name__ == "__main__":
    # Shapes consistent with the module: hidden_size=32 -> input_size=4*32.
    hidden_size = 32
    input_size = 4 * hidden_size  # 128
    output_size = 3               # num classes (SNLI)

    key = jax.random.PRNGKey(0)
    kx, k1, k2, k3, k4, kx2 = jax.random.split(key, 6)

    # Deterministic synthetic parameters (nn.Linear init bounds, stored transposed).
    bound1 = 1.0 / jnp.sqrt(input_size)
    w1 = jax.random.uniform(k1, (input_size, hidden_size),
                            minval=-bound1, maxval=bound1, dtype=jnp.float32)
    b1 = jax.random.uniform(k2, (1, hidden_size),
                            minval=-bound1, maxval=bound1, dtype=jnp.float32)
    bound2 = 1.0 / jnp.sqrt(hidden_size)
    w2 = jax.random.uniform(k3, (hidden_size, output_size),
                            minval=-bound2, maxval=bound2, dtype=jnp.float32)
    b2 = jax.random.uniform(k4, (1, output_size),
                            minval=-bound2, maxval=bound2, dtype=jnp.float32)

    # Fold once (hoisted out of the per-call path).
    wT, bT = fold_prediction_params(w1, b1, w2, b2)

    # --- small batch (single grid step) ---
    B = 8
    x = jax.random.normal(kx, (B, input_size), dtype=jnp.float32)
    out = jax.block_until_ready(prediction_layer_folded(x, wT, bT))
    ref = _reference(x, w1, b1, w2, b2)
    assert out.shape == (B, output_size)
    assert jnp.allclose(out, ref, atol=2e-5, rtol=2e-5), "mismatch vs reference (B=8)"
    assert jnp.allclose(jnp.sum(out, axis=-1), 1.0, atol=1e-5), "rows not normalized"

    # --- larger batch exercising the row-tiled grid (block_rows=512 -> 2 steps) ---
    B2 = 1024
    x2 = jax.random.normal(kx2, (B2, input_size), dtype=jnp.float32)
    out2 = jax.block_until_ready(prediction_layer(x2, w1, b1, w2, b2, block_rows=512))
    ref2 = _reference(x2, w1, b1, w2, b2)
    assert out2.shape == (B2, output_size)
    assert jnp.allclose(out2, ref2, atol=2e-5, rtol=2e-5), "mismatch vs reference (B=1024)"
    assert jnp.allclose(jnp.sum(out2, axis=-1), 1.0, atol=1e-5), "rows not normalized (B=1024)"

    # --- bf16 x/W reads (halves HBM traffic on the x-read-bound kernel) ---
    out3 = jax.block_until_ready(
        prediction_layer_folded(x2, wT, bT, block_rows=512, dot_dtype=jnp.bfloat16))
    assert out3.shape == (B2, output_size)
    assert jnp.allclose(out3, ref2, atol=5e-3, rtol=5e-3), "bf16 path too far from reference"
    assert jnp.allclose(jnp.sum(out3, axis=-1), 1.0, atol=1e-5), "rows not normalized (bf16)"

    print("KERNEL_OK")
</pallas_src>

<mosaic_0001>
module attributes {stable_mosaic.version = 11 : i64} {
  func.func @_prediction_kernel(%arg0: i32, %arg1: memref<8x128xf32, #tpu.memory_space<vmem>>, %arg2: memref<3x128xf32, #tpu.memory_space<vmem>>, %arg3: memref<3x1xf32, #tpu.memory_space<vmem>>, %arg4: memref<3x8xf32, #tpu.memory_space<vmem>>) attributes {dimension_semantics = [#tpu.dimension_semantics<parallel>], iteration_bounds = array<i64: 1>, scalar_prefetch = 0 : i64, scratch_operands = 0 : i64, tpu.core_type = #tpu.core_type<tc>, window_params = [{transform_indices = @transform_0, window_bounds = array<i64: 8, 128>}, {pipeline_mode = #tpu.pipeline_mode<synchronous>, transform_indices = @transform_1, window_bounds = array<i64: 3, 128>}, {pipeline_mode = #tpu.pipeline_mode<synchronous>, transform_indices = @transform_2, window_bounds = array<i64: 3, 1>}, {transform_indices = @transform_3, window_bounds = array<i64: 3, 8>}]} {
    %c0 = arith.constant 0 : index
    %c0_0 = arith.constant 0 : index
    %0 = vector.load %arg2[%c0, %c0_0] : memref<3x128xf32, #tpu.memory_space<vmem>>, vector<3x128xf32>
    %c0_1 = arith.constant 0 : index
    %c0_2 = arith.constant 0 : index
    %1 = vector.load %arg1[%c0_1, %c0_2] : memref<8x128xf32, #tpu.memory_space<vmem>>, vector<8x128xf32>
    %cst = arith.constant dense<0.000000e+00> : vector<3x8xf32>
    %2 = tpu.matmul %0, %1, %cst {dimension_numbers = #tpu.dot_dimension_numbers<[1], [1], [0], [0], [0, 0, 1, 0], [], []>} : vector<3x128xf32>, vector<8x128xf32>, vector<3x8xf32> -> vector<3x8xf32>
    %c0_3 = arith.constant 0 : index
    %c0_4 = arith.constant 0 : index
    %3 = vector.load %arg3[%c0_3, %c0_4] : memref<3x1xf32, #tpu.memory_space<vmem>>, vector<3x1xf32>
    %4 = vector.broadcast %3 : vector<3x1xf32> to vector<3x8xf32>
    %5 = arith.addf %2, %4 : vector<3x8xf32>
    %cst_5 = arith.constant dense<0xFF800000> : vector<8xf32>
    %6 = vector.multi_reduction <maximumf>, %5, %cst_5 [0] : vector<3x8xf32> to vector<8xf32>
    %7 = vector.shape_cast %6 : vector<8xf32> to vector<1x8xf32>
    %8 = vector.broadcast %7 : vector<1x8xf32> to vector<3x8xf32>
    %9 = arith.subf %5, %8 : vector<3x8xf32>
    %10 = math.exp %9 : vector<3x8xf32>
    %cst_6 = arith.constant dense<0.000000e+00> : vector<8xf32>
    %11 = vector.multi_reduction <add>, %10, %cst_6 [0] : vector<3x8xf32> to vector<8xf32>
    %12 = vector.shape_cast %11 : vector<8xf32> to vector<1x8xf32>
    %13 = vector.broadcast %12 : vector<1x8xf32> to vector<3x8xf32>
    %14 = arith.divf %10, %13 : vector<3x8xf32>
    %c0_7 = arith.constant 0 : index
    %c0_8 = arith.constant 0 : index
    %15 = vector.load %arg4[%c0_7, %c0_8] : memref<3x8xf32, #tpu.memory_space<vmem>>, vector<3x8xf32>
    tpu.vector_store %arg4[%c0_7, %c0_8], %14 {strides = array<i32>} : memref<3x8xf32, #tpu.memory_space<vmem>>, vector<3x8xf32>,
    return
  }
  func.func @transform_0(%arg0: i32) -> (i32, i32) {
    %c0_i32 = arith.constant 0 : i32
    %c0_i32_0 = arith.constant 0 : i32
    return %arg0, %c0_i32 : i32, i32
  }
  func.func @transform_1(%arg0: i32) -> (i32, i32) {
    %c0_i32 = arith.constant 0 : i32
    %c0_i32_0 = arith.constant 0 : i32
    %c0_i32_1 = arith.constant 0 : i32
    return %c0_i32, %c0_i32_0 : i32, i32
  }
  func.func @transform_2(%arg0: i32) -> (i32, i32) {
    %c0_i32 = arith.constant 0 : i32
    %c0_i32_0 = arith.constant 0 : i32
    %c0_i32_1 = arith.constant 0 : i32
    return %c0_i32, %c0_i32_0 : i32, i32
  }
  func.func @transform_3(%arg0: i32) -> (i32, i32) {
    %c0_i32 = arith.constant 0 : i32
    %c0_i32_0 = arith.constant 0 : i32
    return %c0_i32, %arg0 : i32, i32
  }
}

</mosaic_0001>

<bundles_post_ra>
// kernel: tpu_custom_call.1
= control target key start
LH: loop header
LB: loop body
LE: loop exit
PB: predicated region body
PF: predicated region fallthrough
CT: control target
= control target key end

     0   :  { %8 = vsyncpa [#allocation3], 0  ;;  %s264_s0 = inlined_call_operand.hbm [shape: f32[8,128], index: 0, kind: input, shape index: {}]   ;;  %s265_s1 = inlined_call_operand.vmem [shape: f32[3,128], index: 1, kind: input, shape index: {}]   ;;  %s266_s2 = inlined_call_operand.vmem [shape: f32[3,1], index: 2, kind: input, shape index: {}]   ;;  %s267_s3 = inlined_call_operand.hbm [shape: f32[3,8], index: 3, kind: output, shape index: {}]  }
   0x1   :  { %9 = vsyncpa [#allocation4], 0  ;;  %s206_s12 = smov [#allocation2]   ;;  %s158_s16 = scalar_lea.hbm %s264_s0, 128 }
   0x2   :  { %s16_s13 = sshll.u32 %s206_s12, 4  ;;  %p159_p0 = scmp.ne.s32.totalorder %s264_s0, %s158_s16  ;;  %s17_s13 = int_to_ptr.vmem [resolvable:$true] %s16_s13 }
   0x3   :  { %p162_p1 = scmp.lt.u32.totalorder %s158_s16, %s264_s0 }
   0x5   :  { %p164_p2 = pnand %p162_p1, %p159_p0 }
   0x7   :  { %167 = shalt.err (!%p164_p2)
}
   0x8   :  { %s168_s21 = scalar_lea.vmem %s17_s13, 128  ;;  %p173_p4 = scmp.lt.s32.totalorder %s17_s13, %s17_s13 }
   0x9   :  { %p169_p3 = scmp.ne.s32.totalorder %s17_s13, %s168_s21  ;;  %p174_p5 = scmp.lt.s32.totalorder %s168_s21, %s168_s21 }
   0xb   :  { %p175_p6 = por %p174_p5, %p173_p4 }
   0xd   :  { %p176_p7 = pnand %p175_p6, %p169_p3 }
   0xf   :  { %179 = shalt.err (!%p176_p7)
}
  0x10   :  { %19 = dma.hbm_to_vmem [thread:$0]  %s264_s0, 128, %s17_s13, [#allocation3]  }
  0x11   :  { %202 = dma.done.wait [#allocation3], 128  }
  0x12   :  { %203 = vsyncadd [#allocation3], 4294967168  ;;  %v207_v0 = vmov 0.0   ;;  %vm208_vm0 = vmmov 0   ;;  %v209_v1 = vmov 0   ;;  %v28_v2 = vld [vmem:[#allocation2] sm:$0xff] }
  0x13   :  { %143 = vmatprep.subr.mxu0 %v207_v0  ;;  %145 = vmatprep.mubr.msk.f32.mxu0 %vm208_vm0, %v207_v0  ;;  %v29_v3 = vld [vmem:[%s266_s2] sm:$0x7]  ;;  %vm105_vm1 = vcmask 59392   ;;  %s210_s0 = smov [#allocation5]  }
  0x14   :  { %153 = vset.pattern.permute.xlu0 %v209_v1  ;;  %144 = vmatpush3.xpose.msra.mxu0 %v28_v2  ;;  %v27_v4 = vld [vmem:[%s265_s1] sm:$0x7]  ;;  %s132_s1 = sshll.u32 %s210_s0, 4  ;;  %s133_s1 = int_to_ptr.vmem [resolvable:$true] %s132_s1 }
  0x15   :  { %32 = vperm.xlu0 %153, %v29_v3   ;;  %s180_s2 = scalar_lea.vmem %s133_s1, 64  ;;  %p185_p9 = scmp.lt.s32.totalorder %s133_s1, %s133_s1 }
  0x16   :  { %p181_p8 = scmp.ne.s32.totalorder %s133_s1, %s180_s2  ;;  %p186_p10 = scmp.lt.s32.totalorder %s180_s2, %s180_s2 }
  0x17   :  { %146 = vmatmul.mubr.f32.vlgmr.msra.gmra.mrb[0].mxu0 %v27_v4 }
  0x18   :  { %p187_p11 = por %p186_p10, %p185_p9 }
  0x1a   :  { %p188_p12 = pnand %p187_p11, %p181_p8 }
  0x94   :  { %v33_v5 = vpop.permute.xlu0 %32 }
  0xea   :  { %v101_v6 = vpop.f32.mrb[0].mxu0 }
  0xeb   :  { %v102_v7 = vadd.f32 %v101_v6, %v33_v5  ;;  %v147_v8 = vpop.f32.mrb[1].mxu0 }
  0xed   :  { %v106_v9 = vsel %vm105_vm1, %v102_v7, -inf }
  0xee   :  { %v107_v10 = vrot.slane %v106_v9, 4 }
  0xf0   :  { %v108_v11 = vmax.f32 %v106_v9, %v107_v10 }
  0xf2   :  { %v109_v12 = vrot.slane %v108_v11, 2 }
  0xf4   :  { %v110_v13 = vmax.f32 %v108_v11, %v109_v12 }
  0xf6   :  { %v111_v14 = vrot.slane %v110_v13, 1 }
  0xf8   :  { %v112_v15 = vmax.f32 %v110_v13, %v111_v14 }
  0xfa   :  { %v113_v16 = vsub.f32 %v102_v7, %v112_v15 }
  0xfc   :  { %v114_v17 = vmul.f32 1.442695, %v113_v16 }
  0xfe   :  { %154 = vpow2.f32 %v114_v17 }
 0x108   :  { %v155_v18 = vpop.eup %154 }
 0x109   :  { %v116_v19 = vsel %vm105_vm1, %v155_v18, 0.0 }
 0x10a   :  { %v117_v20 = vrot.slane %v116_v19, 4 }
 0x10c   :  { %v118_v21 = vadd.f32 %v117_v20, %v116_v19 }
 0x10e   :  { %v119_v22 = vrot.slane %v118_v21, 2 }
 0x110   :  { %v120_v23 = vadd.f32 %v119_v22, %v118_v21 }
 0x112   :  { %v121_v24 = vrot.slane %v120_v23, 1 }
 0x114   :  { %v122_v25 = vadd.f32 %v121_v24, %v120_v23 }
 0x116   :  { %156 = vrcp.f32 %v122_v25 }
 0x120   :  { %v157_v26 = vpop.eup %156 }
 0x121   :  { %v124_v27 = vmul.f32 %v157_v26, %v155_v18 }
 0x123   :  { %125 = vst.msk [vmem:[#allocation5] sm:$0x7] %vm105_vm1, %v124_v27 }
 0x124   :  { %191 = shalt.err (!%p188_p12)
}
 0x125   :  { %s192_s30 = scalar_lea.hbm %s267_s3, 64 }
 0x126   :  { %p193_p13 = scmp.ne.s32.totalorder %s267_s3, %s192_s30  ;;  %p196_p0 = scmp.lt.u32.totalorder %s192_s30, %s267_s3 }
 0x128   :  { %p198_p1 = pnand %p196_p0, %p193_p13 }
 0x12a   :  { %201 = shalt.err (!%p198_p1)
}
 0x12b   :  { %135 = dma.vmem_to_hbm [thread:$0]  %s133_s1, 64, %s267_s3, [#allocation4]  }
 0x12c   :  { %204 = dma.done.wait [#allocation4], 64  }
 0x12d   :  { %205 = vsyncadd [#allocation4], 4294967232 }
 0x12e   :  { %139 = vsyncpa [#allocation3], 1 }
 0x12f   :  { %140 = vsyncpa [#allocation4], 1 }

</bundles_post_ra>
